<compile_context>
chip_gen: v7x
topology: tpu7x:2x2x1
jax: 0.10.0
libtpu: 0.0.40
codegen_flags: <defaults>
</compile_context>

<pallas_src>
import functools

import jax
import jax.numpy as jnp
from jax.experimental import pallas as pl
from jax.experimental.pallas import tpu as pltpu

_MIB = 1 << 20


# ---------------------------------------------------------------------------
# Helpers
# ---------------------------------------------------------------------------

def _round_up(v, m):
    return (v + m - 1) // m * m


def _cdiv(a, b):
    return -(-a // b)


def _vmem_capacity_bytes():
    try:
        info = pltpu.get_tpu_info()
        return int(getattr(info, "vmem_capacity_bytes", 128 * _MIB))
    except Exception:
        return 128 * _MIB


# ---------------------------------------------------------------------------
# Kernels
# ---------------------------------------------------------------------------

def _resident_kernel(x_ref, w_enc_ref, b_enc_ref, w_dec_ref, b_dec_ref, *rest,
                     kc, n_kc, has_skip):
    """Weights fully resident in VMEM; 1-D grid over token tiles.

    The hidden dimension is chunked in-kernel (size kc) only to bound the
    (tm, kc) pre-activation intermediate.
    """
    if has_skip:
        w_skip_t_ref, o_ref, acc_ref = rest
    else:
        o_ref, acc_ref = rest

    x = x_ref[...].astype(jnp.bfloat16)

    # Accumulator init: skip product (if any) folded in here.
    if has_skip:
        acc_ref[...] = jnp.dot(x, w_skip_t_ref[...],
                               preferred_element_type=jnp.float32)
    else:
        acc_ref[...] = jnp.zeros_like(acc_ref)

    if n_kc == 1:
        pre = jnp.dot(x, w_enc_ref[...], preferred_element_type=jnp.float32)
        pre = pre + b_enc_ref[...]
        acts = jnp.maximum(pre, 0.0).astype(jnp.bfloat16)
        acc_ref[...] += jnp.dot(acts, w_dec_ref[...],
                                preferred_element_type=jnp.float32)
    else:
        @pl.loop(0, n_kc)
        def _(j):
            off = pl.multiple_of(j * kc, kc)
            pre = jnp.dot(x, w_enc_ref[:, pl.ds(off, kc)],
                          preferred_element_type=jnp.float32)
            pre = pre + b_enc_ref[:, pl.ds(off, kc)]
            acts = jnp.maximum(pre, 0.0).astype(jnp.bfloat16)
            acc_ref[...] += jnp.dot(acts, w_dec_ref[pl.ds(off, kc), :],
                                    preferred_element_type=jnp.float32)

    o_ref[...] = (acc_ref[...] + b_dec_ref[...]).astype(o_ref.dtype)


def _streamed_kernel(x_ref, w_enc_ref, b_enc_ref, w_dec_ref, b_dec_ref, *rest,
                     has_skip):
    """Weights streamed tile-by-tile; 2-D grid (token tile, K tile)."""
    if has_skip:
        w_skip_t_ref, o_ref, acc_ref = rest
    else:
        o_ref, acc_ref = rest

    k = pl.program_id(1)
    x = x_ref[...].astype(jnp.bfloat16)

    @pl.when(k == 0)
    def _init():
        if has_skip:
            acc_ref[...] = jnp.dot(x, w_skip_t_ref[...],
                                   preferred_element_type=jnp.float32)
        else:
            acc_ref[...] = jnp.zeros_like(acc_ref)

    pre = jnp.dot(x, w_enc_ref[...], preferred_element_type=jnp.float32)
    pre = pre + b_enc_ref[...]
    acts = jnp.maximum(pre, 0.0).astype(jnp.bfloat16)
    acc_ref[...] += jnp.dot(acts, w_dec_ref[...],
                            preferred_element_type=jnp.float32)

    @pl.when(k == pl.num_programs(1) - 1)
    def _finalize():
        o_ref[...] = (acc_ref[...] + b_dec_ref[...]).astype(o_ref.dtype)


# ---------------------------------------------------------------------------
# Tiling / path planner (generation-aware)
# ---------------------------------------------------------------------------

def _plan(n_tokens, d_model, d_transcoder, x_itemsize, out_itemsize,
          has_skip, tm, tk, kc, vmem_cap):
    big = vmem_cap >= 96 * _MIB            # v5e/v6e (128 MiB) vs v7x (64 MiB)
    budget = (100 if big else 48) * _MIB   # working-set budget
    limit_cap = (110 if big else 56) * _MIB

    dt_pad = _round_up(max(d_transcoder, 1), 256)

    def tile_bytes(t):
        # x tile + out tile (double-buffered) + f32 accumulator + bf16 x temp
        return (2 * t * d_model * x_itemsize
                + 2 * t * d_model * out_itemsize
                + t * d_model * 4
                + t * d_model * 2)

    # ---- token tile ---------------------------------------------------------
    if tm is not None:
        tm_ = _round_up(int(tm), 8)
    else:
        default_tm = 1024 if big else 512
        if n_tokens <= 256:
            tm_ = _round_up(max(n_tokens, 1), 8)
        else:
            tm_ = min(default_tm, _round_up(n_tokens, 256))
        min_weight_room = (24 if big else 16) * _MIB
        while tm_ > 256 and tile_bytes(tm_) > budget - min_weight_room:
            tm_ -= 256
        # v7x megacore: keep >= 2 token tiles so both TensorCores get work.
        if (not big) and n_tokens > 256:
            while tm_ > 256 and _cdiv(n_tokens, tm_) < 2:
                tm_ -= 256

    skip_bytes = d_model * d_model * 2 if has_skip else 0   # bf16, Buffered(1)
    bias_bytes = dt_pad * 4 + d_model * 4
    avail = budget - tile_bytes(tm_) - skip_bytes - bias_bytes

    # bf16 W_enc + W_dec, single-buffered (constant index_map + Buffered(1))
    resident_w_bytes = 2 * d_model * dt_pad * 2

    if tk is None and resident_w_bytes <= max(avail, 0) * 9 // 10:
        # ---- weight-resident fast path (1-D grid) ---------------------------
        if kc is not None:
            kc_ = min(_round_up(int(kc), 128), dt_pad)
        else:
            leftover = avail - resident_w_bytes
            kc_ = max(256, min(2048, (leftover // max(6 * tm_, 1)) // 256 * 256))
            kc_ = min(dt_pad, kc_)
        dt_full = _round_up(dt_pad, kc_)
        est = (tile_bytes(tm_) + skip_bytes + bias_bytes
               + 2 * d_model * dt_full * 2 + 6 * tm_ * kc_)
        vmem_limit = min(limit_cap, max(32 * _MIB, int(est * 1.25)))
        return dict(mode="resident", tm=tm_, kc=kc_, n_kc=dt_full // kc_,
                    dt_pad=dt_full, vmem_limit=vmem_limit)

    # ---- streamed fallback (2-D grid, K innermost) ---------------------------
    if tk is not None:
        tk_ = min(_round_up(int(tk), 128), dt_pad)
    else:
        # double-buffered W_enc/W_dec tiles + b_enc tiles + in-kernel temps
        per_tk = 8 * d_model + 8 + 6 * tm_
        tk_ = max(256, min(2048, (max(avail, 0) // per_tk) // 256 * 256))
        tk_ = min(tk_, dt_pad)
    dt_full = _round_up(dt_pad, tk_)
    est = (tile_bytes(tm_) + skip_bytes + d_model * 4
           + 2 * tk_ * 4 + 8 * d_model * tk_ + 6 * tm_ * tk_)
    vmem_limit = min(limit_cap, max(32 * _MIB, int(est * 1.25)))
    return dict(mode="streamed", tm=tm_, tk=tk_, dt_pad=dt_full,
                vmem_limit=vmem_limit)


# ---------------------------------------------------------------------------
# Wrapper
# ---------------------------------------------------------------------------

@functools.partial(jax.jit, static_argnames=("tm", "tk", "kc"))
def single_layer_transcoder_forward(x, W_enc, W_dec, b_enc, b_dec, W_skip=None,
                                    *, tm=None, tk=None, kc=None):
    """Pallas implementation of SingleLayerTranscoder.forward (dense path).

    x: [..., d_model]. Returns an array of the same shape (dtype of x for
    floating inputs). MXU inputs are bf16, accumulation is f32.
    """
    d_model, d_transcoder = W_enc.shape
    orig_shape = x.shape
    has_skip = W_skip is not None

    x2 = x.reshape(-1, d_model)
    n_tokens = x2.shape[0]
    out_dtype = x.dtype if jnp.issubdtype(x.dtype, jnp.floating) else jnp.float32

    plan = _plan(n_tokens, d_model, d_transcoder,
                 jnp.dtype(x2.dtype).itemsize, jnp.dtype(out_dtype).itemsize,
                 has_skip, tm, tk, kc, _vmem_capacity_bytes())
    tm_ = plan["tm"]
    dt_pad = plan["dt_pad"]

    # ---- pad token tail + d_transcoder; weights cast to bf16 (x stays native)
    n_pad = _round_up(max(n_tokens, 1), tm_)
    if n_pad != n_tokens:
        x2 = jnp.pad(x2, ((0, n_pad - n_tokens), (0, 0)))

    W_enc_p, W_dec_p, b_enc_p = W_enc, W_dec, b_enc
    if dt_pad != d_transcoder:
        W_enc_p = jnp.pad(W_enc_p, ((0, 0), (0, dt_pad - d_transcoder)))
        W_dec_p = jnp.pad(W_dec_p, ((0, dt_pad - d_transcoder), (0, 0)))
        b_enc_p = jnp.pad(b_enc_p, (0, dt_pad - d_transcoder))
    W_enc_p = W_enc_p.astype(jnp.bfloat16)
    W_dec_p = W_dec_p.astype(jnp.bfloat16)
    b_enc_p = b_enc_p.reshape(1, dt_pad).astype(jnp.float32)
    b_dec_p = b_dec.reshape(1, d_model).astype(jnp.float32)

    n_tiles = n_pad // tm_
    out_shape = jax.ShapeDtypeStruct((n_pad, d_model), out_dtype)
    scratch_shapes = [pltpu.VMEM((tm_, d_model), jnp.float32)]
    const = dict(pipeline_mode=pl.Buffered(1))   # constant-index blocks

    inputs = [x2, W_enc_p, b_enc_p, W_dec_p, b_dec_p]

    if plan["mode"] == "resident":
        grid = (n_tiles,)
        in_specs = [
            pl.BlockSpec((tm_, d_model), lambda i: (i, 0)),
            pl.BlockSpec((d_model, dt_pad), lambda i: (0, 0), **const),
            pl.BlockSpec((1, dt_pad), lambda i: (0, 0), **const),
            pl.BlockSpec((dt_pad, d_model), lambda i: (0, 0), **const),
            pl.BlockSpec((1, d_model), lambda i: (0, 0), **const),
        ]
        out_spec = pl.BlockSpec((tm_, d_model), lambda i: (i, 0))
        if has_skip:
            in_specs.append(
                pl.BlockSpec((d_model, d_model), lambda i: (0, 0), **const))
            inputs.append(jnp.transpose(W_skip).astype(jnp.bfloat16))
        kernel = functools.partial(_resident_kernel, kc=plan["kc"],
                                   n_kc=plan["n_kc"], has_skip=has_skip)
        dim_sem = ("parallel",)
    else:
        tk_ = plan["tk"]
        grid = (n_tiles, dt_pad // tk_)
        in_specs = [
            pl.BlockSpec((tm_, d_model), lambda i, k: (i, 0)),
            pl.BlockSpec((d_model, tk_), lambda i, k: (0, k)),
            pl.BlockSpec((1, tk_), lambda i, k: (0, k)),
            pl.BlockSpec((tk_, d_model), lambda i, k: (k, 0)),
            pl.BlockSpec((1, d_model), lambda i, k: (0, 0), **const),
        ]
        out_spec = pl.BlockSpec((tm_, d_model), lambda i, k: (i, 0))
        if has_skip:
            in_specs.append(
                pl.BlockSpec((d_model, d_model), lambda i, k: (0, 0), **const))
            inputs.append(jnp.transpose(W_skip).astype(jnp.bfloat16))
        kernel = functools.partial(_streamed_kernel, has_skip=has_skip)
        dim_sem = ("parallel", "arbitrary")

    compiler_params = pltpu.CompilerParams(
        dimension_semantics=dim_sem,
        vmem_limit_bytes=int(plan["vmem_limit"]),
    )

    out = pl.pallas_call(
        kernel,
        out_shape=out_shape,
        grid_spec=pltpu.PrefetchScalarGridSpec(
            num_scalar_prefetch=0,
            grid=grid,
            in_specs=in_specs,
            out_specs=out_spec,
            scratch_shapes=scratch_shapes,
        ),
        compiler_params=compiler_params,
    )(*inputs)

    return out[:n_tokens].reshape(orig_shape)


# ---------------------------------------------------------------------------
# Pure-JAX reference (f32) matching the PyTorch module
# ---------------------------------------------------------------------------

def _reference_forward(x, W_enc, W_dec, b_enc, b_dec, W_skip=None):
    x32 = x.astype(jnp.float32)
    pre = x32 @ W_enc + b_enc
    acts = jnp.maximum(pre, 0.0)
    dec = acts @ W_dec + b_dec
    if W_skip is not None:
        dec = dec + x32 @ W_skip.T
    return dec


if __name__ == "__main__":
    # Small shapes consistent with the module: input_acts [batch, seq, d_model]
    batch, seq = 2, 8
    d_model, d_transcoder = 128, 256

    key = jax.random.PRNGKey(0)
    kx, ke, kd, kbe, kbd, ks, kx2 = jax.random.split(key, 7)

    x = jax.random.normal(kx, (batch, seq, d_model), dtype=jnp.float32)
    W_enc = jax.random.normal(ke, (d_model, d_transcoder), jnp.float32) * 0.05
    W_dec = jax.random.normal(kd, (d_transcoder, d_model), jnp.float32) * 0.05
    b_enc = jax.random.normal(kbe, (d_transcoder,), jnp.float32) * 0.05
    b_dec = jax.random.normal(kbd, (d_model,), jnp.float32) * 0.05
    W_skip = jax.random.normal(ks, (d_model, d_model), jnp.float32) * 0.05

    tol = dict(atol=3e-2, rtol=3e-2)  # bf16 MXU inputs, f32 accumulation

    # 1) skip-connection path, default plan (weight-resident fast path).
    out = single_layer_transcoder_forward(x, W_enc, W_dec, b_enc, b_dec, W_skip)
    out = jax.block_until_ready(out)
    ref = _reference_forward(x, W_enc, W_dec, b_enc, b_dec, W_skip)
    assert out.shape == x.shape and out.dtype == x.dtype
    assert jnp.allclose(out, ref, **tol)

    # 2) no-skip path, default plan.
    out_ns = single_layer_transcoder_forward(x, W_enc, W_dec, b_enc, b_dec, None)
    out_ns = jax.block_until_ready(out_ns)
    ref_ns = _reference_forward(x, W_enc, W_dec, b_enc, b_dec, None)
    assert jnp.allclose(out_ns, ref_ns, **tol)

    # 3) ragged token count + forced tk -> streamed (K-tiled grid) path.
    x_rag = jax.random.normal(kx2, (batch, 5, d_model), dtype=jnp.float32)
    out_rag = single_layer_transcoder_forward(x_rag, W_enc, W_dec, b_enc, b_dec,
                                              W_skip, tk=128)
    out_rag = jax.block_until_ready(out_rag)
    ref_rag = _reference_forward(x_rag, W_enc, W_dec, b_enc, b_dec, W_skip)
    assert out_rag.shape == x_rag.shape
    assert jnp.allclose(out_rag, ref_rag, **tol)

    # 4) resident path with forced small tm/kc -> multi token-tile grid plus
    #    in-kernel K-chunk loop (pl.loop + dynamic slices of resident weights).
    out_ck = single_layer_transcoder_forward(x, W_enc, W_dec, b_enc, b_dec,
                                             W_skip, tm=8, kc=128)
    out_ck = jax.block_until_ready(out_ck)
    assert jnp.allclose(out_ck, ref, **tol)

    print("KERNEL_OK")
</pallas_src>

<mosaic_0001>
module attributes {stable_mosaic.version = 11 : i64} {
  func.func @_resident_kernel(%arg0: i32, %arg1: memref<16x128xf32, #tpu.memory_space<vmem>>, %arg2: memref<128x256xbf16, #tpu.memory_space<vmem>>, %arg3: memref<1x256xf32, #tpu.memory_space<vmem>>, %arg4: memref<256x128xbf16, #tpu.memory_space<vmem>>, %arg5: memref<1x128xf32, #tpu.memory_space<vmem>>, %arg6: memref<128x128xbf16, #tpu.memory_space<vmem>>, %arg7: memref<16x128xf32, #tpu.memory_space<vmem>>, %arg8: memref<16x128xf32, #tpu.memory_space<vmem>>) attributes {dimension_semantics = [#tpu.dimension_semantics<parallel>], iteration_bounds = array<i64: 1>, scalar_prefetch = 0 : i64, scratch_operands = 1 : i64, tpu.core_type = #tpu.core_type<tc>, window_params = [{transform_indices = @transform_0, window_bounds = array<i64: 16, 128>}, {pipeline_mode = #tpu.pipeline_mode<synchronous>, transform_indices = @transform_1, window_bounds = array<i64: 128, 256>}, {pipeline_mode = #tpu.pipeline_mode<synchronous>, transform_indices = @transform_2, window_bounds = array<i64: 1, 256>}, {pipeline_mode = #tpu.pipeline_mode<synchronous>, transform_indices = @transform_3, window_bounds = array<i64: 256, 128>}, {pipeline_mode = #tpu.pipeline_mode<synchronous>, transform_indices = @transform_4, window_bounds = array<i64: 1, 128>}, {pipeline_mode = #tpu.pipeline_mode<synchronous>, transform_indices = @transform_5, window_bounds = array<i64: 128, 128>}, {transform_indices = @transform_6, window_bounds = array<i64: 16, 128>}]} {
    %c0 = arith.constant 0 : index
    %c0_0 = arith.constant 0 : index
    %0 = vector.load %arg1[%c0, %c0_0] : memref<16x128xf32, #tpu.memory_space<vmem>>, vector<16x128xf32>
    %1 = arith.truncf %0 : vector<16x128xf32> to vector<16x128xbf16>
    %c0_1 = arith.constant 0 : index
    %c0_2 = arith.constant 0 : index
    %2 = vector.load %arg6[%c0_1, %c0_2] : memref<128x128xbf16, #tpu.memory_space<vmem>>, vector<128x128xbf16>
    %cst = arith.constant dense<0.000000e+00> : vector<16x128xf32>
    %3 = tpu.matmul %1, %2, %cst {dimension_numbers = #tpu.dot_dimension_numbers<[1], [0], [0], [1], [0, 0, 1, 1], [], []>} : vector<16x128xbf16>, vector<128x128xbf16>, vector<16x128xf32> -> vector<16x128xf32>
    %c0_3 = arith.constant 0 : index
    %c0_4 = arith.constant 0 : index
    %4 = vector.load %arg8[%c0_3, %c0_4] : memref<16x128xf32, #tpu.memory_space<vmem>>, vector<16x128xf32>
    tpu.vector_store %arg8[%c0_3, %c0_4], %3 {strides = array<i32>} : memref<16x128xf32, #tpu.memory_space<vmem>>, vector<16x128xf32>,
    %c0_5 = arith.constant 0 : index
    %c0_6 = arith.constant 0 : index
    %5 = vector.load %arg2[%c0_5, %c0_6] : memref<128x256xbf16, #tpu.memory_space<vmem>>, vector<128x256xbf16>
    %cst_7 = arith.constant dense<0.000000e+00> : vector<16x256xf32>
    %6 = tpu.matmul %1, %5, %cst_7 {dimension_numbers = #tpu.dot_dimension_numbers<[1], [0], [0], [1], [0, 0, 1, 1], [], []>} : vector<16x128xbf16>, vector<128x256xbf16>, vector<16x256xf32> -> vector<16x256xf32>
    %c0_8 = arith.constant 0 : index
    %c0_9 = arith.constant 0 : index
    %7 = vector.load %arg3[%c0_8, %c0_9] : memref<1x256xf32, #tpu.memory_space<vmem>>, vector<1x256xf32>
    %8 = vector.broadcast %7 : vector<1x256xf32> to vector<16x256xf32>
    %9 = arith.addf %6, %8 : vector<16x256xf32>
    %cst_10 = arith.constant 0.000000e+00 : f32
    %10 = vector.broadcast %cst_10 : f32 to vector<16x256xf32>
    %11 = arith.maximumf %9, %10 : vector<16x256xf32>
    %12 = arith.truncf %11 : vector<16x256xf32> to vector<16x256xbf16>
    %c0_11 = arith.constant 0 : index
    %c0_12 = arith.constant 0 : index
    %13 = vector.load %arg8[%c0_11, %c0_12] : memref<16x128xf32, #tpu.memory_space<vmem>>, vector<16x128xf32>
    %c0_13 = arith.constant 0 : index
    %c0_14 = arith.constant 0 : index
    %14 = vector.load %arg4[%c0_13, %c0_14] : memref<256x128xbf16, #tpu.memory_space<vmem>>, vector<256x128xbf16>
    %cst_15 = arith.constant dense<0.000000e+00> : vector<16x128xf32>
    %15 = tpu.matmul %12, %14, %cst_15 {dimension_numbers = #tpu.dot_dimension_numbers<[1], [0], [0], [1], [0, 0, 1, 1], [], []>} : vector<16x256xbf16>, vector<256x128xbf16>, vector<16x128xf32> -> vector<16x128xf32>
    %16 = arith.addf %13, %15 : vector<16x128xf32>
    %c0_16 = arith.constant 0 : index
    %c0_17 = arith.constant 0 : index
    %17 = vector.load %arg8[%c0_16, %c0_17] : memref<16x128xf32, #tpu.memory_space<vmem>>, vector<16x128xf32>
    tpu.vector_store %arg8[%c0_16, %c0_17], %16 {strides = array<i32>} : memref<16x128xf32, #tpu.memory_space<vmem>>, vector<16x128xf32>,
    %c0_18 = arith.constant 0 : index
    %c0_19 = arith.constant 0 : index
    %18 = vector.load %arg8[%c0_18, %c0_19] : memref<16x128xf32, #tpu.memory_space<vmem>>, vector<16x128xf32>
    %c0_20 = arith.constant 0 : index
    %c0_21 = arith.constant 0 : index
    %19 = vector.load %arg5[%c0_20, %c0_21] : memref<1x128xf32, #tpu.memory_space<vmem>>, vector<1x128xf32>
    %20 = vector.broadcast %19 : vector<1x128xf32> to vector<16x128xf32>
    %21 = arith.addf %18, %20 : vector<16x128xf32>
    %c0_22 = arith.constant 0 : index
    %c0_23 = arith.constant 0 : index
    %22 = vector.load %arg7[%c0_22, %c0_23] : memref<16x128xf32, #tpu.memory_space<vmem>>, vector<16x128xf32>
    tpu.vector_store %arg7[%c0_22, %c0_23], %21 {strides = array<i32>} : memref<16x128xf32, #tpu.memory_space<vmem>>, vector<16x128xf32>,
    return
  }
  func.func @transform_0(%arg0: i32) -> (i32, i32) {
    %c0_i32 = arith.constant 0 : i32
    %c0_i32_0 = arith.constant 0 : i32
    return %arg0, %c0_i32 : i32, i32
  }
  func.func @transform_1(%arg0: i32) -> (i32, i32) {
    %c0_i32 = arith.constant 0 : i32
    %c0_i32_0 = arith.constant 0 : i32
    %c0_i32_1 = arith.constant 0 : i32
    return %c0_i32, %c0_i32_0 : i32, i32
  }
  func.func @transform_2(%arg0: i32) -> (i32, i32) {
    %c0_i32 = arith.constant 0 : i32
    %c0_i32_0 = arith.constant 0 : i32
    %c0_i32_1 = arith.constant 0 : i32
    return %c0_i32, %c0_i32_0 : i32, i32
  }
  func.func @transform_3(%arg0: i32) -> (i32, i32) {
    %c0_i32 = arith.constant 0 : i32
    %c0_i32_0 = arith.constant 0 : i32
    %c0_i32_1 = arith.constant 0 : i32
    return %c0_i32, %c0_i32_0 : i32, i32
  }
  func.func @transform_4(%arg0: i32) -> (i32, i32) {
    %c0_i32 = arith.constant 0 : i32
    %c0_i32_0 = arith.constant 0 : i32
    %c0_i32_1 = arith.constant 0 : i32
    return %c0_i32, %c0_i32_0 : i32, i32
  }
  func.func @transform_5(%arg0: i32) -> (i32, i32) {
    %c0_i32 = arith.constant 0 : i32
    %c0_i32_0 = arith.constant 0 : i32
    %c0_i32_1 = arith.constant 0 : i32
    return %c0_i32, %c0_i32_0 : i32, i32
  }
  func.func @transform_6(%arg0: i32) -> (i32, i32) {
    %c0_i32 = arith.constant 0 : i32
    %c0_i32_0 = arith.constant 0 : i32
    return %arg0, %c0_i32 : i32, i32
  }
}

</mosaic_0001>

<bundles_post_ra>
// kernel: single_layer_transcoder_forward.1
= control target key start
LH: loop header
LB: loop body
LE: loop exit
PB: predicated region body
PF: predicated region fallthrough
CT: control target
= control target key end

     0   :  { %v666_v2 = vmov 0   ;;  %v667_v3 = vmov 0.0   ;;  %vm668_vm0 = vmmov 0   ;;  %s851_s0 = inlined_call_operand.vmem [shape: f32[16,128], index: 0, kind: input, shape index: {}]   ;;  %s852_s1 = inlined_call_operand.vmem [shape: bf16[128,256], index: 1, kind: input, shape index: {}]   ;;  %s853_s2 = inlined_call_operand.vmem [shape: f32[1,256], index: 2, kind: input, shape index: {}]   ;;  %s854_s3 = inlined_call_operand.vmem [shape: bf16[256,128], index: 3, kind: input, shape index: {}]   ;;  %s855_s4 = inlined_call_operand.vmem [shape: f32[1,128], index: 4, kind: input, shape index: {}]   ;;  %s856_s5 = inlined_call_operand.vmem [shape: bf16[128,128], index: 5, kind: input, shape index: {}]   ;;  %s857_s6 = inlined_call_operand.hbm [shape: f32[16,128], index: 6, kind: output, shape index: {}]  }
   0x1   :  { %v594_v0 = vld [vmem:[%s852_s1 + $0x4] ss:$8 sps:$4 sm:$0xff]   ;;  %v596_v1 = vld [vmem:[%s852_s1] ss:$8 sps:$4 sm:$0xff]   ;;  %275 = vmatprep.mubr.bf16.mxu1 %v666_v2  ;;  %568 = vmatprep.subr.bf16.mxu0 %v667_v3  ;;  %v597_v4 = vld [vmem:[%s852_s1 + $0x14] ss:$8 sps:$4 sm:$0xff]  }
   0x2   :  { %243 = vmatprep.subr.bf16.mxu1 %v594_v0  ;;  %584 = vmatprep.mubr.msk.bf16.mxu0 %vm668_vm0, %v667_v3  ;;  %v599_v5 = vld [vmem:[%s852_s1 + $0x10] ss:$8 sps:$4 sm:$0xff]   ;;  %v600_v6 = vld [vmem:[%s852_s1 + $0x24] ss:$8 sps:$4 sm:$0xff]   ;;  %v602_v7 = vld [vmem:[%s852_s1 + $0x20] ss:$8 sps:$4 sm:$0xff]  }
   0x3   :  { %244 = vmatpush1.bf16.msra.mxu1 %v596_v1  ;;  %v603_v8 = vld [vmem:[%s852_s1 + $0x34] ss:$8 sps:$4 sm:$0xff]   ;;  %v605_v9 = vld [vmem:[%s852_s1 + $0x30] ss:$8 sps:$4 sm:$0xff]   ;;  %v606_v10 = vld [vmem:[%s852_s1 + $0x44] ss:$8 sps:$4 sm:$0xff]  }
   0x4   :  { %245 = vmatprep.subr.bf16.mxu1 %v597_v4  ;;  %v618_v11 = vld [vmem:[%s856_s5] sm:$0xff]   ;;  %v619_v12 = vld [vmem:[%s856_s5 + $0x8] sm:$0xff]   ;;  %v609_v14 = vld [vmem:[%s852_s1 + $0x54] ss:$8 sps:$4 sm:$0xff]  }
   0x5   :  { %569 = vmatpush3.bf16.msra.mxu0 %v618_v11  ;;  %v608_v13 = vld [vmem:[%s852_s1 + $0x40] ss:$8 sps:$4 sm:$0xff]   ;;  %v620_v15 = vld [vmem:[%s856_s5 + $0x10] sm:$0xff]   ;;  %v612_v17 = vld [vmem:[%s852_s1 + $0x64] ss:$8 sps:$4 sm:$0xff]  }
   0x6   :  { %570 = vmatprep.subr.bf16.mxu0 %v667_v3  ;;  %v611_v16 = vld [vmem:[%s852_s1 + $0x50] ss:$8 sps:$4 sm:$0xff]   ;;  %v614_v19 = vld [vmem:[%s852_s1 + $0x60] ss:$8 sps:$4 sm:$0xff]   ;;  %v615_v20 = vld [vmem:[%s852_s1 + $0x74] ss:$8 sps:$4 sm:$0xff]  }
   0x7   :  { %246 = vmatpush1.bf16.msra.mxu1 %v599_v5  ;;  %v621_v18 = vld [vmem:[%s856_s5 + $0x18] sm:$0xff]   ;;  %v25_v22 = vld [vmem:[%s851_s0] sm:$0xff]  ;;  %v26_v24 = vld [vmem:[%s851_s0 + $0x8] sm:$0xff] }
   0x8   :  { %247 = vmatprep.subr.bf16.mxu1 %v600_v6  ;;  %v617_v21 = vld [vmem:[%s852_s1 + $0x70] ss:$8 sps:$4 sm:$0xff]   ;;  %v622_v23 = vld [vmem:[%s856_s5 + $0x20] sm:$0xff]   ;;  %v27_v25 = vpack.c.bf16 %v26_v24, %v25_v22  ;;  %v623_v26 = vld [vmem:[%s856_s5 + $0x28] sm:$0xff]  }
   0x9   :  { %571 = vmatpush3.bf16.msra.mxu0 %v619_v12  ;;  %v624_v27 = vld [vmem:[%s856_s5 + $0x30] sm:$0xff]  }
   0xa   :  { %572 = vmatprep.subr.bf16.mxu0 %v667_v3 }
   0xb   :  { %248 = vmatpush1.bf16.msra.mxu1 %v602_v7 }
   0xc   :  { %249 = vmatprep.subr.bf16.mxu1 %v603_v8 }
   0xd   :  { %573 = vmatpush3.bf16.msra.mxu0 %v620_v15 }
   0xe   :  { %574 = vmatprep.subr.bf16.mxu0 %v667_v3 }
   0xf   :  { %250 = vmatpush1.bf16.msra.mxu1 %v605_v9 }
  0x10   :  { %251 = vmatprep.subr.bf16.mxu1 %v606_v10 }
  0x11   :  { %575 = vmatpush3.bf16.msra.mxu0 %v621_v18 }
  0x12   :  { %576 = vmatprep.subr.bf16.mxu0 %v667_v3 }
  0x13   :  { %252 = vmatpush1.bf16.msra.mxu1 %v608_v13 }
  0x14   :  { %253 = vmatprep.subr.bf16.mxu1 %v609_v14 }
  0x15   :  { %577 = vmatpush3.bf16.msra.mxu0 %v622_v23 }
  0x16   :  { %578 = vmatprep.subr.bf16.mxu0 %v667_v3 }
  0x17   :  { %254 = vmatpush1.bf16.msra.mxu1 %v611_v16 }
  0x18   :  { %255 = vmatprep.subr.bf16.mxu1 %v612_v17 }
  0x19   :  { %579 = vmatpush3.bf16.msra.mxu0 %v623_v26 }
  0x1b   :  { %256 = vmatpush1.bf16.msra.mxu1 %v614_v19 }
  0x1c   :  { %257 = vmatprep.subr.bf16.mxu1 %v615_v20 }
  0x1f   :  { %258 = vmatpush1.bf16.msra.mxu1 %v617_v21 }
  0x22   :  { %276 = vmatmul.mubr.bf16.vlgmr.msra.gmra.mrb[0].mxu1 %v27_v25 }
  0x23   :  { %11 = vsyncpa [#allocation4], 0  ;;  %580 = vmatprep.subr.bf16.mxu0 %v667_v3  ;;  %v625_v28 = vld [vmem:[%s856_s5 + $0x38] sm:$0xff]   ;;  %v626_v29 = vld [vmem:[%s854_s3 + $0x40] sm:$0xff]   ;;  %v153_v45 = vlaneseq  ;;  %s669_s30 = smov [#allocation3]  }
  0x24   :  { %581 = vmatpush3.bf16.msra.mxu0 %v624_v27  ;;  %v627_v30 = vld [vmem:[%s854_s3] sm:$0xff]   ;;  %v628_v31 = vld [vmem:[%s854_s3 + $0x48] sm:$0xff]   ;;  %v630_v33 = vld [vmem:[%s854_s3 + $0x50] sm:$0xff]   ;;  %s485_s5 = sshll.u32 %s669_s30, 4  ;;  %s486_s5 = int_to_ptr.vmem [resolvable:$true] %s485_s5 }
  0x25   :  { %582 = vmatprep.subr.bf16.mxu0 %v667_v3  ;;  %v629_v32 = vld [vmem:[%s854_s3 + $0x8] sm:$0xff]   ;;  %v631_v34 = vld [vmem:[%s854_s3 + $0x10] sm:$0xff]   ;;  %v632_v35 = vld [vmem:[%s854_s3 + $0x58] sm:$0xff]   ;;  %v154_v46 = vshrl.u32 %v153_v45, 7  ;;  %s642_s7 = scalar_lea.vmem %s486_s5, 256  ;;  %p647_p1 = scmp.lt.s32.totalorder %s486_s5, %s486_s5 }
  0x26   :  { %v633_v36 = vld [vmem:[%s854_s3 + $0x18] sm:$0xff]   ;;  %v634_v37 = vld [vmem:[%s854_s3 + $0x60] sm:$0xff]   ;;  %v636_v39 = vld [vmem:[%s854_s3 + $0x68] sm:$0xff]   ;;  %p643_p0 = scmp.ne.s32.totalorder %s486_s5, %s642_s7  ;;  %p648_p2 = scmp.lt.s32.totalorder %s642_s7, %s642_s7 }
  0x27   :  { %v635_v38 = vld [vmem:[%s854_s3 + $0x20] sm:$0xff]   ;;  %v637_v40 = vld [vmem:[%s854_s3 + $0x28] sm:$0xff]   ;;  %v638_v41 = vld [vmem:[%s854_s3 + $0x70] sm:$0xff]   ;;  %v155_v47 = vsub.s32 0, %v154_v46  ;;  %v159_v49 = vsub.s32 1, %v154_v46 }
  0x28   :  { %583 = vmatpush3.bf16.msra.mxu0 %v625_v28  ;;  %v639_v42 = vld [vmem:[%s854_s3 + $0x30] sm:$0xff]   ;;  %v640_v43 = vld [vmem:[%s854_s3 + $0x78] sm:$0xff]   ;;  %v151_v48 = vld [vmem:[%s853_s2] sm:$0x3]  ;;  %p649_p3 = por %p648_p2, %p647_p1 }
  0x29   :  { %546 = vmatprep.subr.bf16.mxu0 %v626_v29  ;;  %v641_v44 = vld [vmem:[%s854_s3 + $0x38] sm:$0xff]   ;;  %v156_v50 = vrot.slane %v151_v48, %v155_v47  ;;  %v160_v51 = vrot.slane %v151_v48, %v159_v49  ;;  %v536_v10 = vld [vmem:[%s855_s4] ss:$0 sm:$0xff] }
  0x2a   :  { %p650_p4 = pnand %p649_p3, %p643_p0 }
  0x2b   :  { %585 = vmatmul.mubr.bf16.vlgmr.msra.gmra.mrb[0].mxu0 %v27_v25 }
  0x2c   :  { %547 = vmatpush3.bf16.msra.mxu0 %v627_v30 }
  0x2d   :  { %548 = vmatprep.subr.bf16.mxu0 %v628_v31 }
  0x30   :  { %549 = vmatpush3.bf16.msra.mxu0 %v629_v32 }
  0x31   :  { %550 = vmatprep.subr.bf16.mxu0 %v630_v33 }
  0x34   :  { %551 = vmatpush3.bf16.msra.mxu0 %v631_v34 }
  0x35   :  { %552 = vmatprep.subr.bf16.mxu0 %v632_v35 }
  0x38   :  { %553 = vmatpush3.bf16.msra.mxu0 %v633_v36 }
  0x39   :  { %554 = vmatprep.subr.bf16.mxu0 %v634_v37 }
  0x3c   :  { %555 = vmatpush3.bf16.msra.mxu0 %v635_v38 }
  0x3d   :  { %556 = vmatprep.subr.bf16.mxu0 %v636_v39 }
  0x40   :  { %557 = vmatpush3.bf16.msra.mxu0 %v637_v40 }
  0x41   :  { %558 = vmatprep.subr.bf16.mxu0 %v638_v41 }
  0x44   :  { %559 = vmatpush3.bf16.msra.mxu0 %v639_v42 }
  0x45   :  { %560 = vmatprep.subr.bf16.mxu0 %v640_v43 }
  0x48   :  { %561 = vmatpush3.bf16.msra.mxu0 %v641_v44 }
  0xf5   :  { %v277_v52 = vpop.f32.mrb[0].mxu1 }
  0xf6   :  { %v278_v53 = vadd.f32 %v277_v52, %v156_v50  ;;  %v279_v54 = vpop.f32.mrb[1].mxu1 }
  0xf7   :  { %v280_v55 = vadd.f32 %v279_v54, %v160_v51  ;;  %v281_v56 = vpop.f32.mrb[2].mxu1 }
  0xf8   :  { %v282_v57 = vadd.f32 %v281_v56, %v156_v50  ;;  %v283_v58 = vpop.f32.mrb[3].mxu1  ;;  %v286_v60 = vmax.f32 %v278_v53, 0.0 }
  0xf9   :  { %v284_v59 = vadd.f32 %v283_v58, %v160_v51  ;;  %v287_v62 = vmax.f32 %v280_v55, 0.0 }
  0xfa   :  { %v288_v61 = vmax.f32 %v282_v57, 0.0 }
  0xfb   :  { %v289_v63 = vmax.f32 %v284_v59, 0.0 }
  0xfc   :  { %v290_v0 = vpack.c.bf16 %v288_v61, %v286_v60 }
  0xfd   :  { %v291_v1 = vpack.c.bf16 %v289_v63, %v287_v62 }
  0xfe   :  { %v126_v2 = vpop.f32.mrb[0].mxu0 }
  0xff   :  { %454 = vmatprep.mubr.bf16.mxu0 %v291_v1  ;;  %v586_v3 = vpop.f32.mrb[1].mxu0 }
 0x100   :  { %455 = vmatmul.mubr.bf16.vlgmr.msra.gmra.mrb[4].mxu0 %v290_v0  ;;  %v129_v4 = vpop.f32.mrb[2].mxu0 }
 0x101   :  { %v587_v5 = vpop.f32.mrb[3].mxu0 }
 0x1d3   :  { %v562_v6 = vpop.f32.mrb[4].mxu0 }
 0x1d4   :  { %v563_v7 = vpop.f32.mrb[5].mxu0 }
 0x1d5   :  { %v564_v8 = vadd.f32 %v563_v7, %v562_v6  ;;  %v565_v9 = vpop.f32.mrb[6].mxu0 }
 0x1d6   :  { %v566_v11 = vpop.f32.mrb[7].mxu0 }
 0x1d7   :  { %v463_v12 = vadd.f32 %v564_v8, %v126_v2  ;;  %v567_v13 = vadd.f32 %v566_v11, %v565_v9 }
 0x1d9   :  { %v476_v14 = vadd.f32 %v536_v10, %v463_v12  ;;  %v464_v15 = vadd.f32 %v567_v13, %v129_v4 }
 0x1db   :  { %478 = vst [vmem:[#allocation3] sm:$0xff] %v476_v14  ;;  %v477_v16 = vadd.f32 %v536_v10, %v464_v15 }
 0x1dd   :  { %479 = vst [vmem:[#allocation3 + $0x8] sm:$0xff] %v477_v16 }
 0x1de   :  { %653 = shalt.err (!%p650_p4)
}
 0x1df   :  { %s654_s9 = scalar_lea.hbm %s857_s6, 256 }
 0x1e0   :  { %p655_p5 = scmp.ne.s32.totalorder %s857_s6, %s654_s9  ;;  %p658_p6 = scmp.lt.u32.totalorder %s654_s9, %s857_s6 }
 0x1e2   :  { %p660_p7 = pnand %p658_p6, %p655_p5 }
 0x1e4   :  { %663 = shalt.err (!%p660_p7)
}
 0x1e5   :  { %s670_s14 = smov 128   ;;  %s671_s15 = smov 8  }
 0x1e6   :  { %491 = dma.vmem_to_hbm [thread:$0]  %s486_s5, 256, %s857_s6, [#allocation4], %s670_s14, %s670_s14, %s671_s15  }
 0x1e7   :  { %664 = dma.done.wait [#allocation4], 256  }
 0x1e8   :  { %665 = vsyncadd [#allocation4], 4294967040 }
 0x1e9   :  { %495 = vsyncpa [#allocation4], 1 }

</bundles_post_ra>
